<compile_context>
chip_gen: v5e
topology: v5e:2x2
jax: 0.10.0
libtpu: 0.0.40
codegen_flags: <defaults>
</compile_context>

<pallas_src>
import functools
import math

import jax
import jax.numpy as jnp
from jax.experimental import pallas as pl
from jax.experimental.pallas import tpu as pltpu

KSIZE = 9
PAD = 4


def _frame_attention_kernel(x_ref, wt_ref, b_ref, o_ref, *, C, H, W, BT):
    # x_ref:  (BT*C, H*W)  lane/sublane-dense input tile (VMEM)
    # wt_ref: (KSIZE, C)   raw Conv1d weights, transposed (VMEM)
    # b_ref:  (1, 1)       Conv1d bias (SMEM scalar)
    # o_ref:  (BT*C, H*W)
    f32 = jnp.float32
    HW = H * W
    HP = H + 2 * PAD
    R = BT * C
    bias = b_ref[0, 0]

    x = x_ref[...].astype(f32)                                          # (R, HW)

    # --- spatial mean pool (+ conv zero padding) as one MXU contraction ----------
    # pool_m[j, hp] = 1/W  iff  PAD <= hp < PAD+H  and  j in [ (hp-PAD)*W, (hp-PAD)*W + W )
    j_i = jax.lax.broadcasted_iota(jnp.int32, (HW, HP), 0)
    hp_i = jax.lax.broadcasted_iota(jnp.int32, (HW, HP), 1)
    hv = hp_i - PAD
    lo = hv * W
    pool_m = ((j_i >= lo) & (j_i < lo + W) & (hv >= 0) & (hv < H)).astype(f32) * (1.0 / W)
    pooled_pad = jnp.dot(x, pool_m, preferred_element_type=f32)         # (R, H+2*PAD)

    # --- Conv1d(C -> 1, k=9, pad=4) + relu + sigmoid per batch element -----------
    wt = wt_ref[...].astype(f32)                                        # (KSIZE, C)
    score_pre = jnp.zeros((BT, H), f32) + bias
    bsel_row = jax.lax.broadcasted_iota(jnp.int32, (BT, 1), 0)
    for b in range(BT):                                                 # small static unroll
        pp = pooled_pad[b * C:(b + 1) * C, :]                           # (C, H+2*PAD)
        u = jnp.dot(wt, pp, preferred_element_type=f32)                 # (KSIZE, H+2*PAD)
        conv = jnp.zeros((1, H), f32)
        for k in range(KSIZE):                                          # 9-tap band: shifted adds
            conv = conv + u[k:k + 1, k:k + H]
        score_pre = score_pre + jnp.where(bsel_row == b, conv, 0.0)
    scale = jax.nn.sigmoid(jnp.maximum(score_pre, 0.0)) + 1.0           # (BT, H); x*s + x = x*(s+1)

    # --- expand per-(batch, frame) scale to the flat (R, HW) layout (MXU) --------
    h_i = jax.lax.broadcasted_iota(jnp.int32, (H, HW), 0)
    j2_i = jax.lax.broadcasted_iota(jnp.int32, (H, HW), 1)
    col_expand = ((j2_i >= h_i * W) & (j2_i < h_i * W + W)).astype(f32)  # (H, HW)
    if BT == 1:
        scale_rows = jnp.dot(scale, col_expand, preferred_element_type=f32)   # (1, HW) bcast
    else:
        r_i = jax.lax.broadcasted_iota(jnp.int32, (R, BT), 0)
        b_i = jax.lax.broadcasted_iota(jnp.int32, (R, BT), 1)
        row_expand = ((r_i >= b_i * C) & (r_i < b_i * C + C)).astype(f32)      # (R, BT)
        scale_rows = jnp.dot(jnp.dot(row_expand, scale, preferred_element_type=f32),
                             col_expand, preferred_element_type=f32)           # (R, HW)

    o_ref[...] = (x * scale_rows).astype(o_ref.dtype)                   # one lane-dense store


def _pick_batch_block(B, C, HW, itemsize, *, max_bt=8, target_bytes=2 << 20):
    """Largest bt dividing B with bt*C % 8 == 0 (or bt == B), within byte/unroll caps."""
    best = None
    for bt in range(1, B + 1):
        if B % bt:
            continue
        if (bt * C) % 8 != 0 and bt != B:
            continue
        if best is None:
            best = bt                                   # smallest legal tiling (fallback)
        if bt <= max_bt and bt * C * HW * itemsize <= target_bytes:
            best = bt                                   # prefer the largest within caps
    return best if best is not None else B


def frame_attention_forward(x, w, b, *, batch_block=None):
    """x: (B, C, H, W); w: (C, KSIZE) Conv1d weight (out_channels=1); b: (1,) bias."""
    B, C, H, W = x.shape
    HW = H * W
    itemsize = x.dtype.itemsize

    bt = batch_block
    if bt is None or B % bt != 0 or ((bt * C) % 8 != 0 and bt != B):
        bt = _pick_batch_block(B, C, HW, itemsize)
    rows = bt * C

    x2 = x.reshape(B * C, HW)                            # contiguous reshape: free relayout
    wt = jnp.transpose(w).astype(jnp.float32)            # (KSIZE, C)
    bias = jnp.reshape(b, (1, 1)).astype(jnp.float32)

    block_bytes = rows * HW * itemsize
    f32_block = rows * HW * 4
    vmem_limit = int(min(64 * 1024 * 1024,
                         max(16 * 1024 * 1024,
                             4 * block_bytes + 6 * f32_block + (2 << 20))))

    kernel = functools.partial(_frame_attention_kernel, C=C, H=H, W=W, BT=bt)
    out2 = pl.pallas_call(
        kernel,
        out_shape=jax.ShapeDtypeStruct((B * C, HW), x.dtype),
        grid=(B // bt,),
        in_specs=[
            pl.BlockSpec((rows, HW), lambda i: (i, 0)),
            pl.BlockSpec((KSIZE, C), lambda i: (0, 0)),
            pl.BlockSpec(memory_space=pltpu.MemorySpace.SMEM),
        ],
        out_specs=pl.BlockSpec((rows, HW), lambda i: (i, 0)),
        compiler_params=pltpu.CompilerParams(
            dimension_semantics=("parallel",),
            vmem_limit_bytes=vmem_limit,
        ),
    )(x2, wt, bias)
    return out2.reshape(B, C, H, W)


def frame_attention_ref(x, w, b):
    # Pure-JAX reference mirroring the PyTorch forward exactly.
    B, C, H, W = x.shape
    pooled = jnp.mean(x, axis=-1)                                 # AdaptiveAvgPool2d((None,1))
    padded = jnp.pad(pooled, ((0, 0), (0, 0), (PAD, PAD)))
    outs = []
    for h in range(H):
        outs.append(jnp.sum(padded[:, :, h:h + KSIZE] * w[None], axis=(1, 2)))
    conv = jnp.stack(outs, axis=-1) + b                           # Conv1d(C->1, k=9, pad=4)
    score = jax.nn.sigmoid(jnp.maximum(conv, 0.0))                # relu -> sigmoid
    return x * score[:, None, :, None] + x


if __name__ == "__main__":
    B, C, H, W = 2, 4, 16, 16
    key = jax.random.PRNGKey(0)
    kx, kw, kb = jax.random.split(key, 3)

    # Deterministic Conv1d-style init (uniform +-1/sqrt(fan_in), fan_in = C*KSIZE).
    fan_in = C * KSIZE
    bound = 1.0 / math.sqrt(fan_in)
    w = jax.random.uniform(kw, (C, KSIZE), minval=-bound, maxval=bound, dtype=jnp.float32)
    b = jax.random.uniform(kb, (1,), minval=-bound, maxval=bound, dtype=jnp.float32)
    x = jax.random.normal(kx, (B, C, H, W), dtype=jnp.float32)

    out = frame_attention_forward(x, w, b)
    out = jax.block_until_ready(out)

    ref = frame_attention_ref(x, w, b)
    if out.shape != ref.shape or not jnp.allclose(out, ref, rtol=1e-5, atol=1e-5):
        raise AssertionError("Pallas kernel mismatch vs pure-JAX reference")
    print("KERNEL_OK")
</pallas_src>

<mosaic_0001>
module attributes {stable_mosaic.version = 11 : i64} {
  func.func @_frame_attention_kernel(%arg0: i32, %arg1: memref<8x256xf32, #tpu.memory_space<vmem>>, %arg2: memref<9x4xf32, #tpu.memory_space<vmem>>, %arg3: memref<1x1xf32, #tpu.memory_space<smem>>, %arg4: memref<8x256xf32, #tpu.memory_space<vmem>>) attributes {dimension_semantics = [#tpu.dimension_semantics<parallel>], iteration_bounds = array<i64: 1>, scalar_prefetch = 0 : i64, scratch_operands = 0 : i64, tpu.core_type = #tpu.core_type<tc>, window_params = [{transform_indices = @transform_0, window_bounds = array<i64: 8, 256>}, {pipeline_mode = #tpu.pipeline_mode<synchronous>, transform_indices = @transform_1, window_bounds = array<i64: 9, 4>}, {transform_indices = @transform_2, window_bounds = array<i64: 1, 1>}, {transform_indices = @transform_3, window_bounds = array<i64: 8, 256>}]} {
    %c0 = arith.constant 0 : index
    %c0_0 = arith.constant 0 : index
    %0 = memref.load %arg3[%c0, %c0_0] : memref<1x1xf32, #tpu.memory_space<smem>>
    %c0_1 = arith.constant 0 : index
    %c0_2 = arith.constant 0 : index
    %1 = vector.load %arg1[%c0_1, %c0_2] : memref<8x256xf32, #tpu.memory_space<vmem>>, vector<8x256xf32>
    %2 = tpu.iota {dimensions = array<i32: 0>} : vector<256x24xi32>
    %3 = tpu.iota {dimensions = array<i32: 1>} : vector<256x24xi32>
    %c4_i32 = arith.constant 4 : i32
    %4 = vector.broadcast %c4_i32 : i32 to vector<256x24xi32>
    %5 = arith.subi %3, %4 : vector<256x24xi32>
    %c16_i32 = arith.constant 16 : i32
    %6 = vector.broadcast %c16_i32 : i32 to vector<256x24xi32>
    %7 = arith.muli %5, %6 : vector<256x24xi32>
    %8 = arith.cmpi sge, %2, %7 : vector<256x24xi32>
    %c16_i32_3 = arith.constant 16 : i32
    %9 = vector.broadcast %c16_i32_3 : i32 to vector<256x24xi32>
    %10 = arith.addi %7, %9 : vector<256x24xi32>
    %11 = arith.cmpi slt, %2, %10 : vector<256x24xi32>
    %12 = arith.andi %8, %11 : vector<256x24xi1>
    %c0_i32 = arith.constant 0 : i32
    %13 = vector.broadcast %c0_i32 : i32 to vector<256x24xi32>
    %14 = arith.cmpi sge, %5, %13 : vector<256x24xi32>
    %15 = arith.andi %12, %14 : vector<256x24xi1>
    %c16_i32_4 = arith.constant 16 : i32
    %16 = vector.broadcast %c16_i32_4 : i32 to vector<256x24xi32>
    %17 = arith.cmpi slt, %5, %16 : vector<256x24xi32>
    %18 = arith.andi %15, %17 : vector<256x24xi1>
    %19 = arith.extui %18 : vector<256x24xi1> to vector<256x24xi32>
    %20 = arith.sitofp %19 : vector<256x24xi32> to vector<256x24xf32>
    %cst = arith.constant 6.250000e-02 : f32
    %21 = vector.broadcast %cst : f32 to vector<256x24xf32>
    %22 = arith.mulf %20, %21 : vector<256x24xf32>
    %cst_5 = arith.constant dense<0.000000e+00> : vector<8x24xf32>
    %23 = tpu.matmul %1, %22, %cst_5 {dimension_numbers = #tpu.dot_dimension_numbers<[1], [0], [0], [1], [0, 0, 1, 1], [], []>} : vector<8x256xf32>, vector<256x24xf32>, vector<8x24xf32> -> vector<8x24xf32>
    %c0_6 = arith.constant 0 : index
    %c0_7 = arith.constant 0 : index
    %24 = vector.load %arg2[%c0_6, %c0_7] : memref<9x4xf32, #tpu.memory_space<vmem>>, vector<9x4xf32>
    %cst_8 = arith.constant 0.000000e+00 : f32
    %25 = vector.broadcast %cst_8 : f32 to vector<2x16xf32>
    %26 = vector.broadcast %0 : f32 to vector<2x16xf32>
    %27 = arith.addf %25, %26 : vector<2x16xf32>
    %28 = tpu.iota {dimensions = array<i32: 0>} : vector<2x1xi32>
    %29 = vector.extract_strided_slice %23 {offsets = [0, 0], sizes = [4, 24], strides = [1, 1]} : vector<8x24xf32> to vector<4x24xf32>
    %cst_9 = arith.constant dense<0.000000e+00> : vector<9x24xf32>
    %30 = tpu.matmul %24, %29, %cst_9 {dimension_numbers = #tpu.dot_dimension_numbers<[1], [0], [0], [1], [0, 0, 1, 1], [], []>} : vector<9x4xf32>, vector<4x24xf32>, vector<9x24xf32> -> vector<9x24xf32>
    %cst_10 = arith.constant 0.000000e+00 : f32
    %31 = vector.broadcast %cst_10 : f32 to vector<1x16xf32>
    %32 = vector.extract_strided_slice %30 {offsets = [0, 0], sizes = [1, 16], strides = [1, 1]} : vector<9x24xf32> to vector<1x16xf32>
    %33 = arith.addf %31, %32 : vector<1x16xf32>
    %34 = vector.extract_strided_slice %30 {offsets = [1, 1], sizes = [1, 16], strides = [1, 1]} : vector<9x24xf32> to vector<1x16xf32>
    %35 = arith.addf %33, %34 : vector<1x16xf32>
    %36 = vector.extract_strided_slice %30 {offsets = [2, 2], sizes = [1, 16], strides = [1, 1]} : vector<9x24xf32> to vector<1x16xf32>
    %37 = arith.addf %35, %36 : vector<1x16xf32>
    %38 = vector.extract_strided_slice %30 {offsets = [3, 3], sizes = [1, 16], strides = [1, 1]} : vector<9x24xf32> to vector<1x16xf32>
    %39 = arith.addf %37, %38 : vector<1x16xf32>
    %40 = vector.extract_strided_slice %30 {offsets = [4, 4], sizes = [1, 16], strides = [1, 1]} : vector<9x24xf32> to vector<1x16xf32>
    %41 = arith.addf %39, %40 : vector<1x16xf32>
    %42 = vector.extract_strided_slice %30 {offsets = [5, 5], sizes = [1, 16], strides = [1, 1]} : vector<9x24xf32> to vector<1x16xf32>
    %43 = arith.addf %41, %42 : vector<1x16xf32>
    %44 = vector.extract_strided_slice %30 {offsets = [6, 6], sizes = [1, 16], strides = [1, 1]} : vector<9x24xf32> to vector<1x16xf32>
    %45 = arith.addf %43, %44 : vector<1x16xf32>
    %46 = vector.extract_strided_slice %30 {offsets = [7, 7], sizes = [1, 16], strides = [1, 1]} : vector<9x24xf32> to vector<1x16xf32>
    %47 = arith.addf %45, %46 : vector<1x16xf32>
    %48 = vector.extract_strided_slice %30 {offsets = [8, 8], sizes = [1, 16], strides = [1, 1]} : vector<9x24xf32> to vector<1x16xf32>
    %49 = arith.addf %47, %48 : vector<1x16xf32>
    %c0_i32_11 = arith.constant 0 : i32
    %50 = vector.broadcast %c0_i32_11 : i32 to vector<2x1xi32>
    %51 = arith.cmpi eq, %28, %50 : vector<2x1xi32>
    %cst_12 = arith.constant 0.000000e+00 : f32
    %52 = vector.shape_cast %51 : vector<2x1xi1> to vector<2x1xi1>
    %53 = vector.broadcast %52 : vector<2x1xi1> to vector<2x16xi1>
    %54 = vector.shape_cast %49 : vector<1x16xf32> to vector<1x16xf32>
    %55 = vector.broadcast %54 : vector<1x16xf32> to vector<2x16xf32>
    %56 = vector.broadcast %cst_12 : f32 to vector<2x16xf32>
    %57 = arith.select %53, %55, %56 : vector<2x16xi1>, vector<2x16xf32>
    %58 = arith.addf %27, %57 : vector<2x16xf32>
    %59 = vector.extract_strided_slice %23 {offsets = [4, 0], sizes = [4, 24], strides = [1, 1]} : vector<8x24xf32> to vector<4x24xf32>
    %cst_13 = arith.constant dense<0.000000e+00> : vector<9x24xf32>
    %60 = tpu.matmul %24, %59, %cst_13 {dimension_numbers = #tpu.dot_dimension_numbers<[1], [0], [0], [1], [0, 0, 1, 1], [], []>} : vector<9x4xf32>, vector<4x24xf32>, vector<9x24xf32> -> vector<9x24xf32>
    %cst_14 = arith.constant 0.000000e+00 : f32
    %61 = vector.broadcast %cst_14 : f32 to vector<1x16xf32>
    %62 = vector.extract_strided_slice %60 {offsets = [0, 0], sizes = [1, 16], strides = [1, 1]} : vector<9x24xf32> to vector<1x16xf32>
    %63 = arith.addf %61, %62 : vector<1x16xf32>
    %64 = vector.extract_strided_slice %60 {offsets = [1, 1], sizes = [1, 16], strides = [1, 1]} : vector<9x24xf32> to vector<1x16xf32>
    %65 = arith.addf %63, %64 : vector<1x16xf32>
    %66 = vector.extract_strided_slice %60 {offsets = [2, 2], sizes = [1, 16], strides = [1, 1]} : vector<9x24xf32> to vector<1x16xf32>
    %67 = arith.addf %65, %66 : vector<1x16xf32>
    %68 = vector.extract_strided_slice %60 {offsets = [3, 3], sizes = [1, 16], strides = [1, 1]} : vector<9x24xf32> to vector<1x16xf32>
    %69 = arith.addf %67, %68 : vector<1x16xf32>
    %70 = vector.extract_strided_slice %60 {offsets = [4, 4], sizes = [1, 16], strides = [1, 1]} : vector<9x24xf32> to vector<1x16xf32>
    %71 = arith.addf %69, %70 : vector<1x16xf32>
    %72 = vector.extract_strided_slice %60 {offsets = [5, 5], sizes = [1, 16], strides = [1, 1]} : vector<9x24xf32> to vector<1x16xf32>
    %73 = arith.addf %71, %72 : vector<1x16xf32>
    %74 = vector.extract_strided_slice %60 {offsets = [6, 6], sizes = [1, 16], strides = [1, 1]} : vector<9x24xf32> to vector<1x16xf32>
    %75 = arith.addf %73, %74 : vector<1x16xf32>
    %76 = vector.extract_strided_slice %60 {offsets = [7, 7], sizes = [1, 16], strides = [1, 1]} : vector<9x24xf32> to vector<1x16xf32>
    %77 = arith.addf %75, %76 : vector<1x16xf32>
    %78 = vector.extract_strided_slice %60 {offsets = [8, 8], sizes = [1, 16], strides = [1, 1]} : vector<9x24xf32> to vector<1x16xf32>
    %79 = arith.addf %77, %78 : vector<1x16xf32>
    %c1_i32 = arith.constant 1 : i32
    %80 = vector.broadcast %c1_i32 : i32 to vector<2x1xi32>
    %81 = arith.cmpi eq, %28, %80 : vector<2x1xi32>
    %cst_15 = arith.constant 0.000000e+00 : f32
    %82 = vector.shape_cast %81 : vector<2x1xi1> to vector<2x1xi1>
    %83 = vector.broadcast %82 : vector<2x1xi1> to vector<2x16xi1>
    %84 = vector.shape_cast %79 : vector<1x16xf32> to vector<1x16xf32>
    %85 = vector.broadcast %84 : vector<1x16xf32> to vector<2x16xf32>
    %86 = vector.broadcast %cst_15 : f32 to vector<2x16xf32>
    %87 = arith.select %83, %85, %86 : vector<2x16xi1>, vector<2x16xf32>
    %88 = arith.addf %58, %87 : vector<2x16xf32>
    %cst_16 = arith.constant 0.000000e+00 : f32
    %89 = vector.broadcast %cst_16 : f32 to vector<2x16xf32>
    %90 = arith.maximumf %88, %89 : vector<2x16xf32>
    %91 = arith.negf %90 : vector<2x16xf32>
    %92 = math.exp %91 : vector<2x16xf32>
    %cst_17 = arith.constant 1.000000e+00 : f32
    %93 = vector.broadcast %cst_17 : f32 to vector<2x16xf32>
    %94 = arith.addf %93, %92 : vector<2x16xf32>
    %95 = arith.divf %93, %94 : vector<2x16xf32>
    %cst_18 = arith.constant 1.000000e+00 : f32
    %96 = vector.broadcast %cst_18 : f32 to vector<2x16xf32>
    %97 = arith.addf %95, %96 : vector<2x16xf32>
    %98 = tpu.iota {dimensions = array<i32: 0>} : vector<16x256xi32>
    %99 = tpu.iota {dimensions = array<i32: 1>} : vector<16x256xi32>
    %c16_i32_19 = arith.constant 16 : i32
    %100 = vector.broadcast %c16_i32_19 : i32 to vector<16x256xi32>
    %101 = arith.muli %98, %100 : vector<16x256xi32>
    %102 = arith.cmpi sge, %99, %101 : vector<16x256xi32>
    %c16_i32_20 = arith.constant 16 : i32
    %103 = vector.broadcast %c16_i32_20 : i32 to vector<16x256xi32>
    %104 = arith.muli %98, %103 : vector<16x256xi32>
    %c16_i32_21 = arith.constant 16 : i32
    %105 = vector.broadcast %c16_i32_21 : i32 to vector<16x256xi32>
    %106 = arith.addi %104, %105 : vector<16x256xi32>
    %107 = arith.cmpi slt, %99, %106 : vector<16x256xi32>
    %108 = arith.andi %102, %107 : vector<16x256xi1>
    %109 = arith.extui %108 : vector<16x256xi1> to vector<16x256xi32>
    %110 = arith.sitofp %109 : vector<16x256xi32> to vector<16x256xf32>
    %111 = tpu.iota {dimensions = array<i32: 0>} : vector<8x2xi32>
    %112 = tpu.iota {dimensions = array<i32: 1>} : vector<8x2xi32>
    %c4_i32_22 = arith.constant 4 : i32
    %113 = vector.broadcast %c4_i32_22 : i32 to vector<8x2xi32>
    %114 = arith.muli %112, %113 : vector<8x2xi32>
    %115 = arith.cmpi sge, %111, %114 : vector<8x2xi32>
    %c4_i32_23 = arith.constant 4 : i32
    %116 = vector.broadcast %c4_i32_23 : i32 to vector<8x2xi32>
    %117 = arith.muli %112, %116 : vector<8x2xi32>
    %c4_i32_24 = arith.constant 4 : i32
    %118 = vector.broadcast %c4_i32_24 : i32 to vector<8x2xi32>
    %119 = arith.addi %117, %118 : vector<8x2xi32>
    %120 = arith.cmpi slt, %111, %119 : vector<8x2xi32>
    %121 = arith.andi %115, %120 : vector<8x2xi1>
    %122 = arith.extui %121 : vector<8x2xi1> to vector<8x2xi32>
    %123 = arith.sitofp %122 : vector<8x2xi32> to vector<8x2xf32>
    %cst_25 = arith.constant dense<0.000000e+00> : vector<8x16xf32>
    %124 = tpu.matmul %123, %97, %cst_25 {dimension_numbers = #tpu.dot_dimension_numbers<[1], [0], [0], [1], [0, 0, 1, 1], [], []>} : vector<8x2xf32>, vector<2x16xf32>, vector<8x16xf32> -> vector<8x16xf32>
    %cst_26 = arith.constant dense<0.000000e+00> : vector<8x256xf32>
    %125 = tpu.matmul %124, %110, %cst_26 {dimension_numbers = #tpu.dot_dimension_numbers<[1], [0], [0], [1], [0, 0, 1, 1], [], []>} : vector<8x16xf32>, vector<16x256xf32>, vector<8x256xf32> -> vector<8x256xf32>
    %126 = arith.mulf %1, %125 : vector<8x256xf32>
    %c0_27 = arith.constant 0 : index
    %c0_28 = arith.constant 0 : index
    %127 = vector.load %arg4[%c0_27, %c0_28] : memref<8x256xf32, #tpu.memory_space<vmem>>, vector<8x256xf32>
    tpu.vector_store %arg4[%c0_27, %c0_28], %126 {strides = array<i32>} : memref<8x256xf32, #tpu.memory_space<vmem>>, vector<8x256xf32>,
    return
  }
  func.func @transform_0(%arg0: i32) -> (i32, i32) {
    %c0_i32 = arith.constant 0 : i32
    %c0_i32_0 = arith.constant 0 : i32
    return %arg0, %c0_i32 : i32, i32
  }
  func.func @transform_1(%arg0: i32) -> (i32, i32) {
    %c0_i32 = arith.constant 0 : i32
    %c0_i32_0 = arith.constant 0 : i32
    %c0_i32_1 = arith.constant 0 : i32
    return %c0_i32, %c0_i32_0 : i32, i32
  }
  func.func @transform_2(%arg0: i32) -> (i32, i32) {
    %c0_i32 = arith.constant 0 : i32
    %c0_i32_0 = arith.constant 0 : i32
    %c0_i32_1 = arith.constant 0 : i32
    return %c0_i32, %c0_i32_0 : i32, i32
  }
  func.func @transform_3(%arg0: i32) -> (i32, i32) {
    %c0_i32 = arith.constant 0 : i32
    %c0_i32_0 = arith.constant 0 : i32
    return %arg0, %c0_i32 : i32, i32
  }
}

</mosaic_0001>

<bundles_post_ra>
// kernel: tpu_custom_call.1
= control target key start
LH: loop header
LB: loop body
LE: loop exit
PB: predicated region body
PF: predicated region fallthrough
CT: control target
= control target key end

     0   :  { %v19_v0 = vlaneseq  ;;  %s1100_s0 = inlined_call_operand.vmem [shape: f32[8,256], index: 0, kind: input, shape index: {}]   ;;  %s1101_s1 = inlined_call_operand.vmem [shape: f32[9,4], index: 1, kind: input, shape index: {}]   ;;  %s1102_s2 = inlined_call_operand.<no memory space> [shape: f32[1,1], index: 2, kind: input, shape index: {}]   ;;  %s1103_s3 = inlined_call_operand.hbm [shape: f32[8,256], index: 3, kind: output, shape index: {}]  }
   0x1   :  { %9 = vsyncpa [#allocation4], 0  ;;  %v754_v10 = vmov 0.0   ;;  %s755_s19 = smov 124   ;;  %s756_s20 = smov 125  }
   0x2   :  { %v785_v1 = vshrl.u32 %v19_v0, 7  ;;  %v787_v2 = vand.u32 127, %v19_v0  ;;  %s757_s21 = smov 127   ;;  %s758_s22 = smov 121  }
   0x3   :  { %s759_s23 = smov 123   ;;  %s761_s24 = smov 122  }
   0x4   :  { %v35_v3 = vadd.s32 120, %v785_v1  ;;  %v791_v4 = vadd.s32 4294967292, %v787_v2  ;;  %v51_v6 = vadd.s32 248, %v785_v1  ;;  %v34_v8 = vadd.s32 112, %v785_v1  ;;  %s762_s25 = smov 120   ;;  %s651_s4 = sshll.u32 %s1103_s3, 4  ;;  %s652_s4 = int_to_ptr.hbm [resolvable:$true] %s651_s4 }
   0x5   :  { %v50_v9 = vadd.s32 240, %v785_v1  ;;  %v33_v13 = vadd.s32 104, %v785_v1  ;;  %v49_v16 = vadd.s32 232, %v785_v1  ;;  %v32_v19 = vadd.s32 96, %v785_v1 }
   0x6   :  { %v794_v5 = vmul.u32 16, %v791_v4  ;;  %vm153_vm1 = vcmp.ge.s32.totalorder %v791_v4, 0  ;;  %vm186_vm3 = vcmp.lt.s32.totalorder %v791_v4, 16  ;;  %v48_v22 = vadd.s32 224, %v785_v1  ;;  %v355_v4 = vld [vmem:[%s1101_s1] sm:$0xff] }
   0x7   :  { %v31_v25 = vadd.s32 88, %v785_v1  ;;  %v47_v28 = vadd.s32 216, %v785_v1  ;;  %v30_v31 = vadd.s32 80, %v785_v1  ;;  %v46_v34 = vadd.s32 208, %v785_v1 }
   0x8   :  { %vm71_vm0 = vcmp.ge.s32.totalorder %v35_v3, %v794_v5  ;;  %v799_v7 = vadd.s32 16, %v794_v5  ;;  %vm87_vm5 = vcmp.ge.s32.totalorder %v51_v6, %v794_v5  ;;  %vm70_vm10 = vcmp.ge.s32.totalorder %v34_v8, %v794_v5 }
   0x9   :  { %vm86_vm15 = vcmp.ge.s32.totalorder %v50_v9, %v794_v5  ;;  %v29_v37 = vadd.s32 72, %v785_v1  ;;  %v45_v40 = vadd.s32 200, %v785_v1  ;;  %v28_v43 = vadd.s32 64, %v785_v1 }
   0xa   :  { %vm104_vm2 = vcmp.lt.s32.totalorder %v35_v3, %v799_v7  ;;  %vm120_vm6 = vcmp.lt.s32.totalorder %v51_v6, %v799_v7  ;;  %vm103_vm11 = vcmp.lt.s32.totalorder %v34_v8, %v799_v7  ;;  %v44_v46 = vadd.s32 192, %v785_v1 }
   0xb   :  { %vm136_vm4 = vmand %vm71_vm0, %vm104_vm2  ;;  %vm119_vm0 = vcmp.lt.s32.totalorder %v50_v9, %v799_v7  ;;  %v27_v49 = vadd.s32 56, %v785_v1  ;;  %v43_v52 = vadd.s32 184, %v785_v1  ;;  %v26_v55 = vadd.s32 48, %v785_v1 }
   0xc   :  { %vm169_vm7 = vmand %vm136_vm4, %vm153_vm1  ;;  %v42_v58 = vadd.s32 176, %v785_v1  ;;  %v25_v61 = vadd.s32 40, %v785_v1  ;;  %v41_v0 = vadd.s32 168, %v785_v1  ;;  %v24_v8 = vadd.s32 32, %v785_v1 }
   0xd   :  { %vm202_vm8 = vmand %vm169_vm7, %vm186_vm3  ;;  %vm102_vm7 = vcmp.lt.s32.totalorder %v33_v13, %v799_v7 }
   0xe   :  { %v676_v11 = vsel %vm202_vm8, 1.0, %v754_v10  ;;  %vm152_vm9 = vmand %vm87_vm5, %vm120_vm6  ;;  %vm69_vm6 = vcmp.ge.s32.totalorder %v33_v13, %v794_v5 }
   0xf   :  { %v298_v12 = vmul.f32 0.0625, %v676_v11  ;;  %vm185_vm12 = vmand %vm152_vm9, %vm153_vm1 }
  0x10   :  { %vm218_vm13 = vmand %vm185_vm12, %vm186_vm3  ;;  %vm118_vm12 = vcmp.lt.s32.totalorder %v49_v16, %v799_v7 }
  0x11   :  { %315 = vmatpush.msra.mxu0 %v298_v12  ;;  %v692_v14 = vsel %vm218_vm13, 1.0, %v754_v10  ;;  %vm135_vm14 = vmand %vm70_vm10, %vm103_vm11  ;;  %vm85_vm11 = vcmp.ge.s32.totalorder %v49_v16, %v794_v5  ;;  %v40_v12 = vadd.s32 160, %v785_v1 }
  0x12   :  { %v314_v15 = vmul.f32 0.0625, %v692_v14  ;;  %vm168_vm2 = vmand %vm135_vm14, %vm153_vm1 }
  0x13   :  { %vm201_vm4 = vmand %vm168_vm2, %vm186_vm3  ;;  %vm101_vm2 = vcmp.lt.s32.totalorder %v32_v19, %v799_v7 }
  0x14   :  { %335 = vmatpush.msra.mxu1 %v314_v15  ;;  %v675_v17 = vsel %vm201_vm4, 1.0, %v754_v10  ;;  %vm151_vm5 = vmand %vm86_vm15, %vm119_vm0  ;;  %vm68_vm0 = vcmp.ge.s32.totalorder %v32_v19, %v794_v5  ;;  %v23_v15 = vadd.s32 24, %v785_v1 }
  0x15   :  { %v297_v18 = vmul.f32 0.0625, %v675_v17  ;;  %vm184_vm8 = vmand %vm151_vm5, %vm153_vm1 }
  0x16   :  { %vm217_vm9 = vmand %vm184_vm8, %vm186_vm3  ;;  %vm117_vm8 = vcmp.lt.s32.totalorder %v48_v22, %v799_v7 }
  0x17   :  { %316 = vmatpush.msra.mxu0 %v297_v18  ;;  %v691_v20 = vsel %vm217_vm9, 1.0, %v754_v10  ;;  %vm134_vm10 = vmand %vm69_vm6, %vm102_vm7  ;;  %vm84_vm7 = vcmp.ge.s32.totalorder %v48_v22, %v794_v5  ;;  %v39_v18 = vadd.s32 152, %v785_v1 }
  0x18   :  { %v313_v21 = vmul.f32 0.0625, %v691_v20  ;;  %vm167_vm13 = vmand %vm134_vm10, %vm153_vm1 }
  0x19   :  { %vm200_vm14 = vmand %vm167_vm13, %vm186_vm3  ;;  %vm100_vm13 = vcmp.lt.s32.totalorder %v31_v25, %v799_v7 }
  0x1a   :  { %336 = vmatpush.msra.mxu1 %v313_v21  ;;  %v674_v23 = vsel %vm200_vm14, 1.0, %v754_v10  ;;  %vm150_vm15 = vmand %vm85_vm11, %vm118_vm12  ;;  %vm67_vm12 = vcmp.ge.s32.totalorder %v31_v25, %v794_v5  ;;  %v22_v21 = vadd.s32 16, %v785_v1 }
  0x1b   :  { %v296_v24 = vmul.f32 0.0625, %v674_v23  ;;  %vm183_vm4 = vmand %vm150_vm15, %vm153_vm1 }
  0x1c   :  { %vm216_vm5 = vmand %vm183_vm4, %vm186_vm3  ;;  %vm116_vm4 = vcmp.lt.s32.totalorder %v47_v28, %v799_v7 }
  0x1d   :  { %317 = vmatpush.msra.mxu0 %v296_v24  ;;  %v690_v26 = vsel %vm216_vm5, 1.0, %v754_v10  ;;  %vm133_vm6 = vmand %vm68_vm0, %vm101_vm2  ;;  %vm83_vm2 = vcmp.ge.s32.totalorder %v47_v28, %v794_v5  ;;  %v38_v24 = vadd.s32 144, %v785_v1 }
  0x1e   :  { %v312_v27 = vmul.f32 0.0625, %v690_v26  ;;  %vm166_vm9 = vmand %vm133_vm6, %vm153_vm1 }
  0x1f   :  { %vm199_vm10 = vmand %vm166_vm9, %vm186_vm3  ;;  %vm99_vm9 = vcmp.lt.s32.totalorder %v30_v31, %v799_v7 }
  0x20   :  { %337 = vmatpush.msra.mxu1 %v312_v27  ;;  %v673_v29 = vsel %vm199_vm10, 1.0, %v754_v10  ;;  %vm149_vm11 = vmand %vm84_vm7, %vm117_vm8  ;;  %vm66_vm8 = vcmp.ge.s32.totalorder %v30_v31, %v794_v5  ;;  %v1012_v27 = vadd.s32 8, %v785_v1 }
  0x21   :  { %v295_v30 = vmul.f32 0.0625, %v673_v29  ;;  %vm182_vm14 = vmand %vm149_vm11, %vm153_vm1 }
  0x22   :  { %vm215_vm15 = vmand %vm182_vm14, %vm186_vm3  ;;  %vm115_vm14 = vcmp.lt.s32.totalorder %v46_v34, %v799_v7 }
  0x23   :  { %318 = vmatpush.msra.mxu0 %v295_v30  ;;  %v689_v32 = vsel %vm215_vm15, 1.0, %v754_v10  ;;  %vm132_vm0 = vmand %vm67_vm12, %vm100_vm13  ;;  %vm82_vm13 = vcmp.ge.s32.totalorder %v46_v34, %v794_v5  ;;  %v37_v30 = vadd.s32 136, %v785_v1 }
  0x24   :  { %v311_v33 = vmul.f32 0.0625, %v689_v32  ;;  %vm165_vm5 = vmand %vm132_vm0, %vm153_vm1 }
  0x25   :  { %vm198_vm6 = vmand %vm165_vm5, %vm186_vm3  ;;  %vm98_vm5 = vcmp.lt.s32.totalorder %v29_v37, %v799_v7 }
  0x26   :  { %338 = vmatpush.msra.mxu1 %v311_v33  ;;  %v672_v35 = vsel %vm198_vm6, 1.0, %v754_v10  ;;  %vm148_vm7 = vmand %vm83_vm2, %vm116_vm4  ;;  %vm65_vm4 = vcmp.ge.s32.totalorder %v29_v37, %v794_v5 }
  0x27   :  { %v294_v36 = vmul.f32 0.0625, %v672_v35  ;;  %vm181_vm10 = vmand %vm148_vm7, %vm153_vm1  ;;  %v36_v35 = vadd.s32 128, %v785_v1 }
  0x28   :  { %vm214_vm11 = vmand %vm181_vm10, %vm186_vm3  ;;  %vm114_vm10 = vcmp.lt.s32.totalorder %v45_v40, %v799_v7 }
  0x29   :  { %319 = vmatpush.msra.mxu0 %v294_v36  ;;  %v688_v38 = vsel %vm214_vm11, 1.0, %v754_v10  ;;  %vm131_vm12 = vmand %vm66_vm8, %vm99_vm9  ;;  %vm81_vm9 = vcmp.ge.s32.totalorder %v45_v40, %v794_v5 }
  0x2a   :  { %v310_v39 = vmul.f32 0.0625, %v688_v38  ;;  %vm164_vm15 = vmand %vm131_vm12, %vm153_vm1 }
  0x2b   :  { %vm197_vm0 = vmand %vm164_vm15, %vm186_vm3  ;;  %vm97_vm15 = vcmp.lt.s32.totalorder %v28_v43, %v799_v7 }
  0x2c   :  { %339 = vmatpush.msra.mxu1 %v310_v39  ;;  %v671_v41 = vsel %vm197_vm0, 1.0, %v754_v10  ;;  %vm147_vm2 = vmand %vm82_vm13, %vm115_vm14  ;;  %vm64_vm14 = vcmp.ge.s32.totalorder %v28_v43, %v794_v5  ;;  %v1070_v43 = vld [vmem:[%s1100_s0 + $0x8] sm:$0xff] }
  0x2d   :  { %v293_v42 = vmul.f32 0.0625, %v671_v41  ;;  %vm180_vm6 = vmand %vm147_vm2, %vm153_vm1 }
  0x2e   :  { %vm213_vm7 = vmand %vm180_vm6, %vm186_vm3  ;;  %vm113_vm6 = vcmp.lt.s32.totalorder %v44_v46, %v799_v7 }
  0x2f   :  { %320 = vmatpush.msra.mxu0 %v293_v42  ;;  %v687_v44 = vsel %vm213_vm7, 1.0, %v754_v10  ;;  %vm130_vm8 = vmand %vm65_vm4, %vm98_vm5  ;;  %vm80_vm5 = vcmp.ge.s32.totalorder %v44_v46, %v794_v5 }
  0x30   :  { %v309_v45 = vmul.f32 0.0625, %v687_v44  ;;  %vm163_vm11 = vmand %vm130_vm8, %vm153_vm1 }
  0x31   :  { %vm196_vm12 = vmand %vm163_vm11, %vm186_vm3  ;;  %vm96_vm11 = vcmp.lt.s32.totalorder %v27_v49, %v799_v7 }
  0x32   :  { %340 = vmatpush.msra.mxu1 %v309_v45  ;;  %v670_v47 = vsel %vm196_vm12, 1.0, %v754_v10  ;;  %vm146_vm13 = vmand %vm81_vm9, %vm114_vm10  ;;  %vm63_vm10 = vcmp.ge.s32.totalorder %v27_v49, %v794_v5 }
  0x33   :  { %v292_v48 = vmul.f32 0.0625, %v670_v47  ;;  %vm179_vm0 = vmand %vm146_vm13, %vm153_vm1 }
  0x34   :  { %vm212_vm2 = vmand %vm179_vm0, %vm186_vm3  ;;  %vm112_vm0 = vcmp.lt.s32.totalorder %v43_v52, %v799_v7 }
  0x35   :  { %321 = vmatpush.msra.mxu0 %v292_v48  ;;  %v686_v50 = vsel %vm212_vm2, 1.0, %v754_v10  ;;  %vm129_vm4 = vmand %vm64_vm14, %vm97_vm15  ;;  %vm79_vm15 = vcmp.ge.s32.totalorder %v43_v52, %v794_v5  ;;  %v356_v48 = vld [vmem:[%s1101_s1 + $0x8] sm:$0x1]  ;;  %s760_s1 = smov 126  }
  0x36   :  { %v308_v51 = vmul.f32 0.0625, %v686_v50  ;;  %vm162_vm7 = vmand %vm129_vm4, %vm153_vm1 }
  0x37   :  { %vm195_vm8 = vmand %vm162_vm7, %vm186_vm3  ;;  %vm95_vm7 = vcmp.lt.s32.totalorder %v26_v55, %v799_v7 }
  0x38   :  { %341 = vmatpush.msra.mxu1 %v308_v51  ;;  %v669_v53 = vsel %vm195_vm8, 1.0, %v754_v10  ;;  %vm145_vm9 = vmand %vm80_vm5, %vm113_vm6  ;;  %vm62_vm6 = vcmp.ge.s32.totalorder %v26_v55, %v794_v5 }
  0x39   :  { %v291_v54 = vmul.f32 0.0625, %v669_v53  ;;  %vm178_vm12 = vmand %vm145_vm9, %vm153_vm1 }
  0x3a   :  { %vm211_vm13 = vmand %vm178_vm12, %vm186_vm3  ;;  %vm111_vm12 = vcmp.lt.s32.totalorder %v42_v58, %v799_v7 }
  0x3b   :  { %322 = vmatpush.msra.mxu0 %v291_v54  ;;  %v685_v56 = vsel %vm211_vm13, 1.0, %v754_v10  ;;  %vm128_vm14 = vmand %vm63_vm10, %vm96_vm11  ;;  %vm78_vm11 = vcmp.ge.s32.totalorder %v42_v58, %v794_v5 }
  0x3c   :  { %v307_v57 = vmul.f32 0.0625, %v685_v56  ;;  %vm161_vm2 = vmand %vm128_vm14, %vm153_vm1 }
  0x3d   :  { %vm194_vm4 = vmand %vm161_vm2, %vm186_vm3  ;;  %vm94_vm2 = vcmp.lt.s32.totalorder %v25_v61, %v799_v7 }
  0x3e   :  { %342 = vmatpush.msra.mxu1 %v307_v57  ;;  %v668_v59 = vsel %vm194_vm4, 1.0, %v754_v10  ;;  %vm144_vm5 = vmand %vm79_vm15, %vm112_vm0  ;;  %vm61_vm0 = vcmp.ge.s32.totalorder %v25_v61, %v794_v5 }
  0x3f   :  { %v290_v60 = vmul.f32 0.0625, %v668_v59  ;;  %vm177_vm8 = vmand %vm144_vm5, %vm153_vm1 }
  0x40   :  { %vm210_vm9 = vmand %vm177_vm8, %vm186_vm3  ;;  %vm110_vm8 = vcmp.lt.s32.totalorder %v41_v0, %v799_v7 }
  0x41   :  { %323 = vmatpush.msra.mxu0 %v290_v60  ;;  %v684_v62 = vsel %vm210_vm9, 1.0, %v754_v10  ;;  %vm127_vm10 = vmand %vm62_vm6, %vm95_vm7  ;;  %vm77_vm7 = vcmp.ge.s32.totalorder %v41_v0, %v794_v5 }
  0x42   :  { %v306_v63 = vmul.f32 0.0625, %v684_v62  ;;  %vm160_vm13 = vmand %vm127_vm10, %vm153_vm1 }
  0x43   :  { %vm193_vm14 = vmand %vm160_vm13, %vm186_vm3  ;;  %vm93_vm13 = vcmp.lt.s32.totalorder %v24_v8, %v799_v7 }
  0x44   :  { %343 = vmatpush.msra.mxu1 %v306_v63  ;;  %v667_v3 = vsel %vm193_vm14, 1.0, %v754_v10  ;;  %vm143_vm15 = vmand %vm78_vm11, %vm111_vm12  ;;  %vm60_vm12 = vcmp.ge.s32.totalorder %v24_v8, %v794_v5 }
  0x45   :  { %v289_v6 = vmul.f32 0.0625, %v667_v3  ;;  %vm176_vm4 = vmand %vm143_vm15, %vm153_vm1 }
  0x46   :  { %vm209_vm5 = vmand %vm176_vm4, %vm186_vm3  ;;  %vm109_vm4 = vcmp.lt.s32.totalorder %v40_v12, %v799_v7 }
  0x47   :  { %324 = vmatpush.msra.mxu0 %v289_v6  ;;  %v683_v9 = vsel %vm209_vm5, 1.0, %v754_v10  ;;  %vm126_vm6 = vmand %vm61_vm0, %vm94_vm2  ;;  %vm76_vm2 = vcmp.ge.s32.totalorder %v40_v12, %v794_v5 }
  0x48   :  { %v305_v11 = vmul.f32 0.0625, %v683_v9  ;;  %vm159_vm9 = vmand %vm126_vm6, %vm153_vm1 }
  0x49   :  { %vm192_vm10 = vmand %vm159_vm9, %vm186_vm3  ;;  %vm92_vm9 = vcmp.lt.s32.totalorder %v23_v15, %v799_v7 }
  0x4a   :  { %344 = vmatpush.msra.mxu1 %v305_v11  ;;  %v666_v13 = vsel %vm192_vm10, 1.0, %v754_v10  ;;  %vm142_vm11 = vmand %vm77_vm7, %vm110_vm8  ;;  %vm59_vm8 = vcmp.ge.s32.totalorder %v23_v15, %v794_v5 }
  0x4b   :  { %v288_v14 = vmul.f32 0.0625, %v666_v13  ;;  %vm175_vm14 = vmand %vm142_vm11, %vm153_vm1 }
  0x4c   :  { %vm208_vm15 = vmand %vm175_vm14, %vm186_vm3  ;;  %vm108_vm14 = vcmp.lt.s32.totalorder %v39_v18, %v799_v7 }
  0x4d   :  { %325 = vmatpush.msra.mxu0 %v288_v14  ;;  %v682_v16 = vsel %vm208_vm15, 1.0, %v754_v10  ;;  %vm125_vm0 = vmand %vm60_vm12, %vm93_vm13  ;;  %vm75_vm13 = vcmp.ge.s32.totalorder %v39_v18, %v794_v5 }
  0x4e   :  { %v304_v17 = vmul.f32 0.0625, %v682_v16  ;;  %vm158_vm5 = vmand %vm125_vm0, %vm153_vm1 }
  0x4f   :  { %vm191_vm6 = vmand %vm158_vm5, %vm186_vm3  ;;  %vm91_vm5 = vcmp.lt.s32.totalorder %v22_v21, %v799_v7 }
  0x50   :  { %345 = vmatpush.msra.mxu1 %v304_v17  ;;  %v665_v19 = vsel %vm191_vm6, 1.0, %v754_v10  ;;  %vm141_vm7 = vmand %vm76_vm2, %vm109_vm4  ;;  %vm58_vm4 = vcmp.ge.s32.totalorder %v22_v21, %v794_v5 }
  0x51   :  { %v287_v20 = vmul.f32 0.0625, %v665_v19  ;;  %vm174_vm10 = vmand %vm141_vm7, %vm153_vm1 }
  0x52   :  { %vm207_vm11 = vmand %vm174_vm10, %vm186_vm3  ;;  %vm107_vm10 = vcmp.lt.s32.totalorder %v38_v24, %v799_v7 }
  0x53   :  { %326 = vmatpush.msra.mxu0 %v287_v20  ;;  %v681_v22 = vsel %vm207_vm11, 1.0, %v754_v10  ;;  %vm124_vm12 = vmand %vm59_vm8, %vm92_vm9  ;;  %vm74_vm9 = vcmp.ge.s32.totalorder %v38_v24, %v794_v5 }
  0x54   :  { %v303_v23 = vmul.f32 0.0625, %v681_v22  ;;  %vm157_vm15 = vmand %vm124_vm12, %vm153_vm1 }
  0x55   :  { %vm190_vm0 = vmand %vm157_vm15, %vm186_vm3  ;;  %vm90_vm15 = vcmp.lt.s32.totalorder %v1012_v27, %v799_v7 }
  0x56   :  { %346 = vmatpush.msra.mxu1 %v303_v23  ;;  %v664_v25 = vsel %vm190_vm0, 1.0, %v754_v10  ;;  %vm140_vm2 = vmand %vm75_vm13, %vm108_vm14  ;;  %vm57_vm14 = vcmp.ge.s32.totalorder %v1012_v27, %v794_v5 }
  0x57   :  { %v286_v26 = vmul.f32 0.0625, %v664_v25  ;;  %vm173_vm6 = vmand %vm140_vm2, %vm153_vm1 }
  0x58   :  { %vm206_vm7 = vmand %vm173_vm6, %vm186_vm3  ;;  %vm106_vm6 = vcmp.lt.s32.totalorder %v37_v30, %v799_v7 }
  0x59   :  { %327 = vmatpush.msra.mxu0 %v286_v26  ;;  %v680_v28 = vsel %vm206_vm7, 1.0, %v754_v10  ;;  %vm123_vm8 = vmand %vm58_vm4, %vm91_vm5  ;;  %vm73_vm5 = vcmp.ge.s32.totalorder %v37_v30, %v794_v5 }
  0x5a   :  { %v302_v29 = vmul.f32 0.0625, %v680_v28  ;;  %vm156_vm11 = vmand %vm123_vm8, %vm153_vm1 }
  0x5b   :  { %vm189_vm12 = vmand %vm156_vm11, %vm186_vm3  ;;  %vm89_vm11 = vcmp.lt.s32.totalorder %v785_v1, %v799_v7 }
  0x5c   :  { %347 = vmatpush.msra.mxu1 %v302_v29  ;;  %v663_v31 = vsel %vm189_vm12, 1.0, %v754_v10  ;;  %vm139_vm13 = vmand %vm74_vm9, %vm107_vm10  ;;  %vm56_vm10 = vcmp.ge.s32.totalorder %v785_v1, %v794_v5 }
  0x5d   :  { %v285_v32 = vmul.f32 0.0625, %v663_v31  ;;  %vm172_vm0 = vmand %vm139_vm13, %vm153_vm1 }
  0x5e   :  { %vm205_vm2 = vmand %vm172_vm0, %vm186_vm3  ;;  %vm105_vm0 = vcmp.lt.s32.totalorder %v36_v35, %v799_v7 }
  0x5f   :  { %328 = vmatpush.msra.mxu0 %v285_v32  ;;  %v679_v33 = vsel %vm205_vm2, 1.0, %v754_v10  ;;  %vm122_vm4 = vmand %vm57_vm14, %vm90_vm15  ;;  %vm72_vm15 = vcmp.ge.s32.totalorder %v36_v35, %v794_v5  ;;  %v1061_v5 = vld [vmem:[%s1100_s0] sm:$0xff] }
  0x60   :  { %v301_v34 = vmul.f32 0.0625, %v679_v33  ;;  %vm155_vm7 = vmand %vm122_vm4, %vm153_vm1 }
  0x61   :  { %vm188_vm8 = vmand %vm155_vm7, %vm186_vm3 }
  0x62   :  { %348 = vmatpush.msra.mxu1 %v301_v34  ;;  %v662_v36 = vsel %vm188_vm8, 1.0, %v754_v10  ;;  %vm138_vm9 = vmand %vm73_vm5, %vm106_vm6  ;;  %vm435_vm8 = vcmp.eq.s32.totalorder %v785_v1, 0 }
  0x63   :  { %v284_v37 = vmul.f32 0.0625, %v662_v36  ;;  %vm171_vm12 = vmand %vm138_vm9, %vm153_vm1  ;;  %vm509_vm9 = vcmp.eq.s32.totalorder %v785_v1, 1 }
  0x64   :  { %vm204_vm13 = vmand %vm171_vm12, %vm186_vm3 }
  0x65   :  { %329 = vmatpush.msra.mxu0 %v284_v37  ;;  %v678_v38 = vsel %vm204_vm13, 1.0, %v754_v10  ;;  %vm121_vm14 = vmand %vm56_vm10, %vm89_vm11 }
  0x66   :  { %v300_v39 = vmul.f32 0.0625, %v678_v38  ;;  %vm154_vm2 = vmand %vm121_vm14, %vm153_vm1 }
  0x67   :  { %vm187_vm4 = vmand %vm154_vm2, %vm186_vm3 }
  0x68   :  { %349 = vmatpush.msra.mxu1 %v300_v39  ;;  %v661_v40 = vsel %vm187_vm4, 1.0, %v754_v10  ;;  %vm137_vm5 = vmand %vm72_vm15, %vm105_vm0 }
  0x69   :  { %v283_v41 = vmul.f32 0.0625, %v661_v40  ;;  %vm170_vm6 = vmand %vm137_vm5, %vm153_vm1  ;;  %vm366_vm1 = vcmask 1043456  }
  0x6a   :  { %vm203_vm7 = vmand %vm170_vm6, %vm186_vm3  ;;  %vm359_vm3 = vcmask 31744  }
  0x6b   :  { %330 = vmatpush.msra.mxu0 %v283_v41  ;;  %v677_v7 = vsel %vm203_vm7, 1.0, %v754_v10 }
  0x6c   :  { %v299_v42 = vmul.f32 0.0625, %v677_v7  ;;  %331 = vmatmul.f32.vlgmr.msra.gmra.mxu0 %v1061_v5  ;;  %v357_v7 = vstv %s1102_s2  ;;  %s764_s2 = smov [#allocation3]  }
  0x6d   :  { %s649_s28 = sshll.u32 %s764_s2, 4  ;;  %s650_s28 = int_to_ptr.vmem [resolvable:$true] %s649_s28 }
  0x6e   :  { %350 = vmatpush.msra.mxu1 %v299_v42 }
  0x6f   :  { %351 = vmatmul.f32.vlgmr.msra.gmra.mxu1 %v1070_v43 }
  0xe9   :  { %v332_v44 = vpop.f32.mrf.mxu0 }
  0xec   :  { %v352_v45 = vpop.f32.mrf.mxu1 }
  0xed   :  { %v353_v46 = vadd.f32 %v352_v45, %v332_v44 }
  0xef   :  { %693 = vmatpush.msk.msra.mxu2 %vm366_vm1, %v353_v46  ;;  %v441_v47 = vrot.slane %v353_v46, 4 }
  0xf0   :  { %694 = vmatmul.msk.f32.vlgmr.msra.gmra.mxu2 %vm359_vm3, %v355_v4 }
  0xf1   :  { %696 = vmatpush.msk.msra.mxu3 %vm366_vm1, %v441_v47 }
  0xf2   :  { %697 = vmatmul.msk.f32.vlgmr.msra.gmra.mxu3 %vm359_vm3, %v355_v4 }
  0xf8   :  { %695 = vmatmul.msk.f32.gmra.mxu2 %vm359_vm3, %v356_v48 }
  0xfa   :  { %698 = vmatmul.msk.f32.gmra.mxu3 %vm359_vm3, %v356_v48 }
 0x173   :  { %v387_v49 = vpop.f32.mrf.mxu2 }
 0x174   :  { %v410_v50 = vrot.slane %v387_v49, 4  ;;  %v405_v51 = vrot.slane %v387_v49, 3  ;;  %v395_v52 = vrot.slane %v387_v49, 1  ;;  %v425_v53 = vrot.slane %v387_v49, 7 }
 0x175   :  { %v415_v54 = vrot.slane %v387_v49, 5  ;;  %v400_v55 = vrot.slane %v387_v49, 2  ;;  %v461_v56 = vpop.f32.mrf.mxu3  ;;  %v420_v59 = vrot.slane %v387_v49, 6 }
 0x176   :  { %411 = vrot.lane.b32.xlu2 %v410_v50, %s755_s19  ;;  %406 = vrot.lane.b32.xlu1 %v405_v51, %s756_s20  ;;  %v474_v57 = vrot.slane %v461_v56, 2  ;;  %v469_v58 = vrot.slane %v461_v56, 1  ;;  %v484_v60 = vrot.slane %v461_v56, 4  ;;  %v489_v61 = vrot.slane %v461_v56, 5 }
 0x177   :  { %396 = vrot.lane.b32.xlu0 %v395_v52, %s757_s21  ;;  %v479_v62 = vrot.slane %v461_v56, 3  ;;  %v499_v0 = vrot.slane %v461_v56, 7  ;;  %v494_v3 = vrot.slane %v461_v56, 6  ;;  %v537_v50 = vmul.u32 16, %v785_v1 }
 0x179   :  { %vm539_vm11 = vcmp.ge.s32.totalorder %v787_v2, %v537_v50 }
 0x17b   :  { %v390_v63 = vpop.f32.mrf.mxu2 }
 0x17d   :  { %v464_v6 = vpop.f32.mrf.mxu3 }
 0x17e   :  { %426 = vrot.lane.b32.xlu2 %v425_v53, %s758_s22  ;;  %416 = vrot.lane.b32.xlu1 %v415_v54, %s759_s23  ;;  %v543_v53 = vadd.s32 16, %v537_v50  ;;  %v763_v54 = vmov 1.0  }
 0x17f   :  { %401 = vrot.lane.b32.xlu0 %v400_v55, %s760_s1 }
 0x180   :  { %vm545_vm13 = vcmp.lt.s32.totalorder %v787_v2, %v543_v53 }
 0x181   :  { %vm549_vm15 = vmand %vm539_vm11, %vm545_vm13 }
 0x186   :  { %475 = vrot.lane.b32.xlu2 %v474_v57, %s760_s1  ;;  %470 = vrot.lane.b32.xlu1 %v469_v58, %s757_s21 }
 0x187   :  { %421 = vrot.lane.b32.xlu0 %v420_v59, %s761_s24 }
 0x18e   :  { %485 = vrot.lane.b32.xlu2 %v484_v60, %s755_s19  ;;  %490 = vrot.lane.b32.xlu1 %v489_v61, %s759_s23 }
 0x18f   :  { %480 = vrot.lane.b32.xlu0 %v479_v62, %s756_s20 }
 0x196   :  { %500 = vrot.lane.b32.xlu2 %v499_v0, %s758_s22  ;;  %431 = vrot.lane.b32.xlu1 %v390_v63, %s762_s25  ;;  %v536_v0 = vadd.s32 128, %v787_v2 }
 0x197   :  { %495 = vrot.lane.b32.xlu0 %v494_v3, %s761_s24 }
 0x198   :  { %vm540_vm11 = vcmp.ge.s32.totalorder %v536_v0, %v537_v50 }
 0x19f   :  { %505 = vrot.lane.b32.xlu0 %v464_v6, %s762_s25 }
 0x1d0   :  { %v412_v8 = vpop.permute.xlu2 %411 }
 0x1d8   :  { %v427_v13 = vpop.permute.xlu2 %426 }
 0x1e0   :  { %v476_v20 = vpop.permute.xlu2 %475 }
 0x1e8   :  { %v407_v9 = vpop.permute.xlu1 %406  ;;  %v486_v30 = vpop.permute.xlu2 %485 }
 0x1e9   :  { %v397_v11 = vpop.permute.xlu0 %396 }
 0x1ea   :  { %v399_v15 = vadd.f32 %v397_v11, %v387_v49  ;;  %v538_v49 = vmul.u32 16, %v1012_v27 }
 0x1ec   :  { %vm541_vm10 = vcmp.ge.s32.totalorder %v787_v2, %v538_v49  ;;  %v544_v52 = vadd.s32 16, %v538_v49  ;;  %vm542_vm3 = vcmp.ge.s32.totalorder %v536_v0, %v538_v49 }
 0x1ee   :  { %vm547_vm12 = vcmp.lt.s32.totalorder %v787_v2, %v544_v52 }
 0x1ef   :  { %vm551_vm14 = vmand %vm541_vm10, %vm547_vm12  ;;  %vm568_vm10 = vcmask 15360   ;;  %vm546_vm12 = vcmp.lt.s32.totalorder %v536_v0, %v543_v53 }
 0x1f0   :  { %v417_v12 = vpop.permute.xlu1 %416  ;;  %v501_v39 = vpop.permute.xlu2 %500  ;;  %707 = vmatpush.msk.msrb.mxu3 %vm551_vm14, %v763_v54  ;;  %vm550_vm14 = vmand %vm540_vm11, %vm546_vm12 }
 0x1f1   :  { %v402_v14 = vpop.permute.xlu0 %401 }
 0x1f2   :  { %v404_v16 = vadd.f32 %v402_v14, %v399_v15  ;;  %708 = vmatpush.msk.msrb.mxu3 %vm549_vm15, %v763_v54  ;;  %vm596_vm15 = vcmask 130048  }
 0x1f4   :  { %v409_v17 = vadd.f32 %v407_v9, %v404_v16 }
 0x1f6   :  { %v414_v22 = vadd.f32 %v412_v8, %v409_v17 }
 0x1f8   :  { %v471_v18 = vpop.permute.xlu1 %470  ;;  %v419_v23 = vadd.f32 %v417_v12, %v414_v22 }
 0x1f9   :  { %v422_v19 = vpop.permute.xlu0 %421  ;;  %v473_v21 = vadd.f32 %v471_v18, %v461_v56  ;;  %v561_v56 = vmul.u32 4, %v787_v2 }
 0x1fa   :  { %v424_v29 = vadd.f32 %v422_v19, %v419_v23 }
 0x1fb   :  { %v478_v25 = vadd.f32 %v476_v20, %v473_v21  ;;  %v563_v58 = vadd.s32 4, %v561_v56  ;;  %vm562_vm0 = vcmp.ge.s32.totalorder %v785_v1, %v561_v56 }
 0x1fc   :  { %v429_v32 = vadd.f32 %v427_v13, %v424_v29 }
 0x1fd   :  { %vm564_vm2 = vcmp.lt.s32.totalorder %v785_v1, %v563_v58 }
 0x1fe   :  { %vm565_vm6 = vmand %vm562_vm0, %vm564_vm2 }
 0x1ff   :  { %v704_v11 = vsel %vm565_vm6, 1.0, %v754_v10 }
 0x200   :  { %v491_v24 = vpop.permute.xlu1 %490 }
 0x201   :  { %v481_v26 = vpop.permute.xlu0 %480 }
 0x202   :  { %v483_v28 = vadd.f32 %v481_v26, %v478_v25 }
 0x204   :  { %v488_v31 = vadd.f32 %v486_v30, %v483_v28 }
 0x206   :  { %v493_v35 = vadd.f32 %v491_v24, %v488_v31 }
 0x208   :  { %v432_v33 = vpop.permute.xlu1 %431 }
 0x209   :  { %v496_v34 = vpop.permute.xlu0 %495  ;;  %v434_v36 = vadd.f32 %v432_v33, %v429_v32 }
 0x20a   :  { %v498_v37 = vadd.f32 %v496_v34, %v493_v35 }
 0x20b   :  { %v438_v38 = vperm.slane %v434_v36, 0 }
 0x20c   :  { %v503_v40 = vadd.f32 %v501_v39, %v498_v37 }
 0x20d   :  { %v439_v42 = vsel %vm435_vm8, %v438_v38, 0.0  ;;  %vm548_vm8 = vcmp.lt.s32.totalorder %v536_v0, %v544_v52 }
 0x20e   :  { %v440_v46 = vadd.f32 %v439_v42, %v357_v7  ;;  %vm552_vm13 = vmand %vm542_vm3, %vm548_vm8 }
 0x211   :  { %v506_v41 = vpop.permute.xlu0 %505 }
 0x212   :  { %v508_v44 = vadd.f32 %v506_v41, %v503_v40 }
 0x214   :  { %v512_v45 = vperm.slane %v508_v44, 0 }
 0x216   :  { %v513_v4 = vsel %vm509_vm9, %v512_v45, 0.0  ;;  %vm572_vm9 = vcmask 1041408  }
 0x217   :  { %v514_v47 = vadd.f32 %v513_v4, %v440_v46 }
 0x219   :  { %v515_v48 = vmax.f32 %v514_v47, 0.0 }
 0x21b   :  { %v699_v51 = vmul.f32 -1.442695, %v515_v48 }
 0x21d   :  { %724 = vpow2.f32 %v699_v51 }
 0x223   :  { %v725_v27 = vpop.eup %724 }
 0x224   :  { %v519_v55 = vadd.f32 1.0, %v725_v27 }
 0x226   :  { %726 = vrcp.f32 %v519_v55  ;;  %v531_v61 = vand.u32 2147483648, %v519_v55  ;;  %v529_v63 = vand.u32 2147483647, %v519_v55  ;;  %vm525_vm5 = vweird.f32 %v519_v55 }
 0x228   :  { %v532_v6 = vor.u32 1.1754944e-38, %v531_v61  ;;  %vm530_vm1 = vcmp.eq.f32.partialorder %v529_v63, 8.507059e+37 }
 0x22c   :  { %v727_v57 = vpop.eup %726 }
 0x22d   :  { %v521_v59 = vmul.f32 %v727_v57, %v519_v55  ;;  %vm526_vm4 = vweird.f32 %v727_v57 }
 0x22e   :  { %vm527_vm7 = vmor %vm525_vm5, %vm526_vm4 }
 0x22f   :  { %v522_v60 = vsub.f32 1.0, %v521_v59 }
 0x231   :  { %v523_v62 = vmul.f32 %v727_v57, %v522_v60 }
 0x233   :  { %v524_v3 = vadd.f32 %v727_v57, %v523_v62 }
 0x235   :  { %v528_v8 = vsel %vm527_vm7, %v727_v57, %v524_v3 }
 0x236   :  { %v533_v9 = vsel %vm530_vm1, %v532_v6, %v528_v8 }
 0x237   :  { %v535_v12 = vadd.f32 1.0, %v533_v9 }
 0x239   :  { %705 = vmatpush.msk.msrb.mxu2 %vm572_vm9, %v535_v12 }
 0x23a   :  { %706 = vmatmul.msk.f32.vlgmr.msrb.gmra.mxu2 %vm568_vm10, %v704_v11 }
 0x23b   :  { %710 = vmatpush.msk.msra.mxu2 %vm552_vm13, %v763_v54 }
 0x23d   :  { %711 = vmatpush.msk.msra.mxu2 %vm550_vm14, %v763_v54 }
 0x2bd   :  { %v593_v1 = vpop.f32.mrf.mxu2 }
 0x2be   :  { %709 = vmatmul.msk.f32.vlgmr.msrb.gmra.mxu3 %vm596_vm15, %v593_v1  ;;  %712 = vmatmul.msk.f32.vlgmr.msra.gmra.mxu2 %vm596_vm15, %v593_v1 }
 0x341   :  { %v617_v2 = vpop.f32.mrf.mxu3  ;;  %v637_v10 = vpop.f32.mrf.mxu2 }
 0x342   :  { %v640_v13 = vmul.f32 %v617_v2, %v1061_v5  ;;  %v641_v14 = vmul.f32 %v637_v10, %v1070_v43 }
 0x344   :  { %642 = vst [vmem:[#allocation3] sm:$0xff] %v640_v13 }
 0x345   :  { %643 = vst [vmem:[#allocation3 + $0x8] sm:$0xff] %v641_v14 }
 0x346   :  { %654 = dma.vmem_to_hbm [thread:$0]  %s650_s28, 256, %s652_s4, [#allocation4]  }
 0x347   :  { %752 = dma.done.wait [#allocation4], 256  }
 0x348   :  { %753 = vsyncadd [#allocation4], 4294967040 }
 0x349   :  { %659 = vsyncpa [#allocation4], 1 }

</bundles_post_ra>
